<compile_context>
chip_gen: v5e
topology: v5e:2x2
jax: 0.10.0
libtpu: 0.0.40
codegen_flags: <defaults>
</compile_context>

<pallas_src>
import jax
import jax.numpy as jnp
from jax.experimental import pallas as pl
from jax.experimental.pallas import tpu as pltpu


def _round_up(x, m):
    return (x + m - 1) // m * m


def valuenet_kernel(xT_ref, w1T_ref, b1_ref, w2_ref, b2_ref, o_ref):
    # xT_ref : (S, TB)   streamed activation tile (batch on lanes)
    # w1T_ref: (H, S)    resident fc1 weight (transposed)
    # b1_ref : (H, 1)    resident fc1 bias (column)
    # w2_ref : (H, 1)    resident fc2 weight (column)
    # b2_ref : (1,)      fc2 bias scalar in SMEM
    # o_ref  : (1, TB)   lane-dense output tile
    h = jnp.dot(w1T_ref[...], xT_ref[...],
                preferred_element_type=jnp.float32)          # (H, TB) on the MXU
    # Single fused chain (bias + ReLU + scale + reduce) -> no materialized
    # (H, TB) intermediate beyond what regalloc needs.
    v = jnp.sum(jnp.maximum(h + b1_ref[...], 0.0) * w2_ref[...],
                axis=0, keepdims=True)                        # (1, TB) on VPU/XLU
    o_ref[...] = v + b2_ref[0]


def value_net_forward(x, w1, b1, w2, b2, *, block_b=4096):
    """x: (B, S) f32; w1: (S, H); b1: (H,); w2: (H,); b2: (1,). Returns (B, 1) f32."""
    B, S = x.shape
    H = w1.shape[1]

    # 128-aligned tile-size policy:
    #   * block_b is forced to a multiple of 128 (lowering guard).
    #   * tiny batches (<= 128): single step, minimal padding (rollout path).
    #   * larger batches: at least 2 grid steps (both TCs on v7x), each step
    #     capped at block_b (default 4096 -> step footprint is a couple MiB,
    #     far under VMEM on every generation).
    block_b = _round_up(max(block_b, 128), 128)
    Bp128 = _round_up(max(B, 1), 128)
    if Bp128 <= 128:
        TB = Bp128
    else:
        TB = min(block_b, _round_up(-(-Bp128 // 2), 128))
    Bp = _round_up(B, TB)

    # Fused pad + transpose (single XLA op chain, no zeros+scatter HBM pass).
    xT = jnp.pad(x.astype(jnp.float32), ((0, Bp - B), (0, 0))).T   # (S, Bp)
    w1T = w1.T.astype(jnp.float32)                                 # (H, S)
    b1c = b1.reshape(H, 1).astype(jnp.float32)                     # (H, 1)
    w2c = w2.reshape(H, 1).astype(jnp.float32)                     # (H, 1)
    b2s = b2.reshape(1).astype(jnp.float32)                        # (1,) -> SMEM

    out = pl.pallas_call(
        valuenet_kernel,
        out_shape=jax.ShapeDtypeStruct((1, Bp), jnp.float32),
        grid=(Bp // TB,),
        in_specs=[
            pl.BlockSpec((S, TB), lambda i: (0, i)),            # streamed x tile
            pl.BlockSpec((H, S), lambda i: (0, 0)),             # resident weights
            pl.BlockSpec((H, 1), lambda i: (0, 0)),
            pl.BlockSpec((H, 1), lambda i: (0, 0)),
            pl.BlockSpec(memory_space=pltpu.MemorySpace.SMEM),  # b2 scalar
        ],
        out_specs=pl.BlockSpec((1, TB), lambda i: (0, i)),
        compiler_params=pltpu.CompilerParams(
            dimension_semantics=("parallel",)),
    )(xT, w1T, b1c, w2c, b2s)

    return out[:, :B].reshape(B, 1)


def init_params(key, state_dim, hidden_dim):
    """Mimic torch.nn.Linear default init: U(-1/sqrt(fan_in), 1/sqrt(fan_in))."""
    k1, k2, k3, k4 = jax.random.split(key, 4)
    bound1 = 1.0 / jnp.sqrt(jnp.float32(state_dim))
    bound2 = 1.0 / jnp.sqrt(jnp.float32(hidden_dim))
    w1 = jax.random.uniform(k1, (state_dim, hidden_dim), jnp.float32, -bound1, bound1)
    b1 = jax.random.uniform(k2, (hidden_dim,), jnp.float32, -bound1, bound1)
    w2 = jax.random.uniform(k3, (hidden_dim,), jnp.float32, -bound2, bound2)
    b2 = jax.random.uniform(k4, (1,), jnp.float32, -bound2, bound2)
    return w1, b1, w2, b2


def _reference(x, w1, b1, w2, b2):
    return jnp.maximum(x @ w1 + b1[None, :], 0.0) @ w2.reshape(-1, 1) + b2.reshape(1, 1)


if __name__ == "__main__":
    dof = 3
    state_dim = dof * 2     # env.observation_space.shape[0] == 6
    hidden_dim = 128

    key = jax.random.PRNGKey(0)
    kx, kx2, kx3, kp = jax.random.split(key, 4)
    w1, b1, w2, b2 = init_params(kp, state_dim, hidden_dim)

    # Small-batch case (matches the RL rollout shape): single 128-wide step.
    batch = 8
    x = jax.random.normal(kx, (batch, state_dim), jnp.float32)
    out = jax.block_until_ready(value_net_forward(x, w1, b1, w2, b2))
    ref = _reference(x, w1, b1, w2, b2)
    assert out.shape == (batch, 1)
    assert jnp.allclose(out, ref, atol=1e-5, rtol=1e-5)

    # Default policy on a medium batch: >= 2 grid steps (v7x dual-TC split),
    # exercises batch padding + resident weights + lane-dense streaming.
    batch2 = 300
    x2 = jax.random.normal(kx2, (batch2, state_dim), jnp.float32)
    out2 = jax.block_until_ready(value_net_forward(x2, w1, b1, w2, b2))
    ref2 = _reference(x2, w1, b1, w2, b2)
    assert out2.shape == (batch2, 1)
    assert jnp.allclose(out2, ref2, atol=1e-5, rtol=1e-5)

    # Non-128-aligned block_b (guard path): rounded up internally, multi-step grid.
    batch3 = 513
    x3 = jax.random.normal(kx3, (batch3, state_dim), jnp.float32)
    out3 = jax.block_until_ready(value_net_forward(x3, w1, b1, w2, b2, block_b=200))
    ref3 = _reference(x3, w1, b1, w2, b2)
    assert out3.shape == (batch3, 1)
    assert jnp.allclose(out3, ref3, atol=1e-5, rtol=1e-5)

    print("KERNEL_OK")
</pallas_src>

<mosaic_0001>
module attributes {stable_mosaic.version = 11 : i64} {
  func.func @valuenet_kernel(%arg0: i32, %arg1: memref<6x128xf32, #tpu.memory_space<vmem>>, %arg2: memref<128x6xf32, #tpu.memory_space<vmem>>, %arg3: memref<128x1xf32, #tpu.memory_space<vmem>>, %arg4: memref<128x1xf32, #tpu.memory_space<vmem>>, %arg5: memref<1xf32, #tpu.memory_space<smem>>, %arg6: memref<1x128xf32, #tpu.memory_space<vmem>>) attributes {dimension_semantics = [#tpu.dimension_semantics<parallel>], iteration_bounds = array<i64: 1>, scalar_prefetch = 0 : i64, scratch_operands = 0 : i64, tpu.core_type = #tpu.core_type<tc>, window_params = [{transform_indices = @transform_0, window_bounds = array<i64: 6, 128>}, {pipeline_mode = #tpu.pipeline_mode<synchronous>, transform_indices = @transform_1, window_bounds = array<i64: 128, 6>}, {pipeline_mode = #tpu.pipeline_mode<synchronous>, transform_indices = @transform_2, window_bounds = array<i64: 128, 1>}, {pipeline_mode = #tpu.pipeline_mode<synchronous>, transform_indices = @transform_3, window_bounds = array<i64: 128, 1>}, {transform_indices = @transform_4, window_bounds = array<i64: 1>}, {transform_indices = @transform_5, window_bounds = array<i64: 1, 128>}]} {
    %c0 = arith.constant 0 : index
    %c0_0 = arith.constant 0 : index
    %0 = vector.load %arg2[%c0, %c0_0] : memref<128x6xf32, #tpu.memory_space<vmem>>, vector<128x6xf32>
    %c0_1 = arith.constant 0 : index
    %c0_2 = arith.constant 0 : index
    %1 = vector.load %arg1[%c0_1, %c0_2] : memref<6x128xf32, #tpu.memory_space<vmem>>, vector<6x128xf32>
    %cst = arith.constant dense<0.000000e+00> : vector<128x128xf32>
    %2 = tpu.matmul %0, %1, %cst {dimension_numbers = #tpu.dot_dimension_numbers<[1], [0], [0], [1], [0, 0, 1, 1], [], []>} : vector<128x6xf32>, vector<6x128xf32>, vector<128x128xf32> -> vector<128x128xf32>
    %c0_3 = arith.constant 0 : index
    %c0_4 = arith.constant 0 : index
    %3 = vector.load %arg3[%c0_3, %c0_4] : memref<128x1xf32, #tpu.memory_space<vmem>>, vector<128x1xf32>
    %4 = vector.broadcast %3 : vector<128x1xf32> to vector<128x128xf32>
    %5 = arith.addf %2, %4 : vector<128x128xf32>
    %cst_5 = arith.constant 0.000000e+00 : f32
    %6 = vector.broadcast %cst_5 : f32 to vector<128x128xf32>
    %7 = arith.maximumf %5, %6 : vector<128x128xf32>
    %c0_6 = arith.constant 0 : index
    %c0_7 = arith.constant 0 : index
    %8 = vector.load %arg4[%c0_6, %c0_7] : memref<128x1xf32, #tpu.memory_space<vmem>>, vector<128x1xf32>
    %9 = vector.broadcast %8 : vector<128x1xf32> to vector<128x128xf32>
    %10 = arith.mulf %7, %9 : vector<128x128xf32>
    %cst_8 = arith.constant dense<0.000000e+00> : vector<128xf32>
    %11 = vector.multi_reduction <add>, %10, %cst_8 [0] : vector<128x128xf32> to vector<128xf32>
    %12 = vector.shape_cast %11 : vector<128xf32> to vector<1x128xf32>
    %c0_9 = arith.constant 0 : index
    %13 = memref.load %arg5[%c0_9] : memref<1xf32, #tpu.memory_space<smem>>
    %14 = vector.broadcast %13 : f32 to vector<1x128xf32>
    %15 = arith.addf %12, %14 : vector<1x128xf32>
    %c0_10 = arith.constant 0 : index
    %c0_11 = arith.constant 0 : index
    %16 = vector.load %arg6[%c0_10, %c0_11] : memref<1x128xf32, #tpu.memory_space<vmem>>, vector<1x128xf32>
    tpu.vector_store %arg6[%c0_10, %c0_11], %15 {strides = array<i32>} : memref<1x128xf32, #tpu.memory_space<vmem>>, vector<1x128xf32>,
    return
  }
  func.func @transform_0(%arg0: i32) -> (i32, i32) {
    %c0_i32 = arith.constant 0 : i32
    %c0_i32_0 = arith.constant 0 : i32
    return %c0_i32, %arg0 : i32, i32
  }
  func.func @transform_1(%arg0: i32) -> (i32, i32) {
    %c0_i32 = arith.constant 0 : i32
    %c0_i32_0 = arith.constant 0 : i32
    %c0_i32_1 = arith.constant 0 : i32
    return %c0_i32, %c0_i32_0 : i32, i32
  }
  func.func @transform_2(%arg0: i32) -> (i32, i32) {
    %c0_i32 = arith.constant 0 : i32
    %c0_i32_0 = arith.constant 0 : i32
    %c0_i32_1 = arith.constant 0 : i32
    return %c0_i32, %c0_i32_0 : i32, i32
  }
  func.func @transform_3(%arg0: i32) -> (i32, i32) {
    %c0_i32 = arith.constant 0 : i32
    %c0_i32_0 = arith.constant 0 : i32
    %c0_i32_1 = arith.constant 0 : i32
    return %c0_i32, %c0_i32_0 : i32, i32
  }
  func.func @transform_4(%arg0: i32) -> i32 {
    %c0_i32 = arith.constant 0 : i32
    %c0_i32_0 = arith.constant 0 : i32
    return %c0_i32 : i32
  }
  func.func @transform_5(%arg0: i32) -> (i32, i32) {
    %c0_i32 = arith.constant 0 : i32
    %c0_i32_0 = arith.constant 0 : i32
    return %c0_i32, %arg0 : i32, i32
  }
}

</mosaic_0001>

<bundles_post_ra>
// kernel: tpu_custom_call.1
= control target key start
LH: loop header
LB: loop body
LE: loop exit
PB: predicated region body
PF: predicated region fallthrough
CT: control target
= control target key end

     0   :  { %vm184_vm0 = vcmask 1045504   ;;  %v473_v1 = vmov 0   ;;  %vm135_vm1 = vcmask 48128   ;;  %s689_s0 = inlined_call_operand.vmem [shape: f32[6,128], index: 0, kind: input, shape index: {}]   ;;  %s690_s1 = inlined_call_operand.vmem [shape: f32[128,6], index: 1, kind: input, shape index: {}]   ;;  %s691_s2 = inlined_call_operand.vmem [shape: f32[128,1], index: 2, kind: input, shape index: {}]   ;;  %s692_s3 = inlined_call_operand.vmem [shape: f32[128,1], index: 3, kind: input, shape index: {}]   ;;  %s693_s4 = inlined_call_operand.<no memory space> [shape: f32[1], index: 4, kind: input, shape index: {}]   ;;  %s694_s5 = inlined_call_operand.hbm [shape: f32[1,128], index: 5, kind: output, shape index: {}]  }
   0x1   :  { %v38_v0 = vld [vmem:[%s689_s0] sm:$0x3f]  ;;  %446 = vset.pattern.permute.xlu2 %v473_v1  ;;  %445 = vset.pattern.permute.xlu1 %v473_v1  ;;  %v41_v3 = vld [vmem:[%s691_s2 + $0x10] sm:$0xff]  ;;  %v44_v9 = vld [vmem:[%s691_s2 + $0x28] sm:$0xff] }
   0x2   :  { %v43_v2 = vld [vmem:[%s691_s2 + $0x20] sm:$0xff]  ;;  %444 = vset.pattern.permute.xlu0 %v473_v1  ;;  %422 = vmatpush.msk.msra.mxu0 %vm184_vm0, %v38_v0  ;;  %v42_v10 = vld [vmem:[%s691_s2 + $0x18] sm:$0xff]  ;;  %v40_v11 = vld [vmem:[%s691_s2 + $0x8] sm:$0xff] }
   0x3   :  { %v39_v4 = vld [vmem:[%s691_s2] sm:$0xff]  ;;  %439 = vmatpush.msk.msra.mxu1 %vm184_vm0, %v38_v0  ;;  %440 = vmatpush.msk.msra.mxu2 %vm184_vm0, %v38_v0  ;;  %v23_v12 = vld [vmem:[%s690_s1 + $0x8] sm:$0xff] }
   0x4   :  { %v22_v5 = vld [vmem:[%s690_s1] sm:$0xff]  ;;  %441 = vmatpush.msk.msra.mxu3 %vm184_vm0, %v38_v0  ;;  %77 = vperm.xlu2 %446, %v43_v2   ;;  %v27_v13 = vld [vmem:[%s690_s1 + $0x28] sm:$0xff] }
   0x5   :  { %v26_v6 = vld [vmem:[%s690_s1 + $0x20] sm:$0xff]  ;;  %67 = vperm.xlu1 %445, %v41_v3   ;;  %57 = vperm.xlu0 %444, %v39_v4  }
   0x6   :  { %v30_v7 = vld [vmem:[%s690_s1 + $0x40] sm:$0xff]  ;;  %423 = vmatmul.msk.f32.vlgmr.msra.gmra.mxu0 %vm135_vm1, %v22_v5  ;;  %427 = vmatmul.msk.f32.vlgmr.msra.gmra.mxu1 %vm135_vm1, %v26_v6 }
   0x7   :  { %v34_v8 = vld [vmem:[%s690_s1 + $0x60] sm:$0xff]  ;;  %431 = vmatmul.msk.f32.vlgmr.msra.gmra.mxu2 %vm135_vm1, %v30_v7 }
   0x8   :  { %435 = vmatmul.msk.f32.vlgmr.msra.gmra.mxu3 %vm135_vm1, %v34_v8 }
   0x9   :  { %11 = vsyncpa [#allocation4], 0  ;;  %v31_v14 = vld [vmem:[%s690_s1 + $0x48] sm:$0xff]  ;;  %v47_v16 = vld [vmem:[%s691_s2 + $0x40] sm:$0xff]  ;;  %s474_s10 = smov [#allocation3]   ;;  %s413_s14 = sshll.u32 %s694_s5, 4  ;;  %s414_s14 = int_to_ptr.hbm [resolvable:$true] %s413_s14 }
   0xa   :  { %v35_v15 = vld [vmem:[%s690_s1 + $0x68] sm:$0xff]  ;;  %v46_v17 = vld [vmem:[%s691_s2 + $0x38] sm:$0xff]  ;;  %v45_v18 = vld [vmem:[%s691_s2 + $0x30] sm:$0xff]  ;;  %s411_s11 = sshll.u32 %s474_s10, 4  ;;  %s412_s11 = int_to_ptr.vmem [resolvable:$true] %s411_s11 }
   0xb   :  { %v24_v19 = vld [vmem:[%s690_s1 + $0x10] sm:$0xff]  ;;  %v50_v23 = vld [vmem:[%s691_s2 + $0x58] sm:$0xff]  ;;  %v48_v25 = vld [vmem:[%s691_s2 + $0x48] sm:$0xff] }
   0xc   :  { %82 = vperm.xlu2 %446, %v44_v9   ;;  %v28_v20 = vld [vmem:[%s690_s1 + $0x30] sm:$0xff]  ;;  %v25_v26 = vld [vmem:[%s690_s1 + $0x18] sm:$0xff]  ;;  %v52_v31 = vld [vmem:[%s691_s2 + $0x68] sm:$0xff] }
   0xd   :  { %72 = vperm.xlu1 %445, %v42_v10   ;;  %62 = vperm.xlu0 %444, %v40_v11   ;;  %v32_v21 = vld [vmem:[%s690_s1 + $0x50] sm:$0xff]  ;;  %v29_v27 = vld [vmem:[%s690_s1 + $0x38] sm:$0xff]  ;;  %v51_v32 = vld [vmem:[%s691_s2 + $0x60] sm:$0xff] }
   0xe   :  { %424 = vmatmul.msk.f32.gmra.mxu0 %vm135_vm1, %v23_v12  ;;  %428 = vmatmul.msk.f32.gmra.mxu1 %vm135_vm1, %v27_v13  ;;  %v36_v22 = vld [vmem:[%s690_s1 + $0x70] sm:$0xff]  ;;  %v33_v28 = vld [vmem:[%s690_s1 + $0x58] sm:$0xff]  ;;  %v270_v33 = vld [vmem:[%s692_s3 + $0x8] sm:$0xff] }
   0xf   :  { %432 = vmatmul.msk.f32.gmra.mxu2 %vm135_vm1, %v31_v14  ;;  %v49_v24 = vld [vmem:[%s691_s2 + $0x50] sm:$0xff]  ;;  %v37_v29 = vld [vmem:[%s690_s1 + $0x78] sm:$0xff]  ;;  %v269_v34 = vld [vmem:[%s692_s3] sm:$0xff] }
  0x10   :  { %436 = vmatmul.msk.f32.gmra.mxu3 %vm135_vm1, %v35_v15  ;;  %v53_v30 = vld [vmem:[%s691_s2 + $0x70] sm:$0xff]  ;;  %v54_v35 = vld [vmem:[%s691_s2 + $0x78] sm:$0xff]  ;;  %v273_v36 = vld [vmem:[%s692_s3 + $0x20] sm:$0xff] }
  0x11   :  { %v272_v37 = vld [vmem:[%s692_s3 + $0x18] sm:$0xff]  ;;  %v271_v38 = vld [vmem:[%s692_s3 + $0x10] sm:$0xff]  ;;  %v274_v41 = vld [vmem:[%s692_s3 + $0x28] sm:$0xff] }
  0x12   :  { %v276_v39 = vld [vmem:[%s692_s3 + $0x38] sm:$0xff]  ;;  %v275_v40 = vld [vmem:[%s692_s3 + $0x30] sm:$0xff]  ;;  %v278_v43 = vld [vmem:[%s692_s3 + $0x48] sm:$0xff] }
  0x13   :  { %v279_v42 = vld [vmem:[%s692_s3 + $0x50] sm:$0xff]  ;;  %v277_v44 = vld [vmem:[%s692_s3 + $0x40] sm:$0xff]  ;;  %v282_v45 = vld [vmem:[%s692_s3 + $0x68] sm:$0xff] }
  0x14   :  { %97 = vperm.xlu2 %446, %v47_v16   ;;  %v281_v46 = vld [vmem:[%s692_s3 + $0x60] sm:$0xff]  ;;  %v280_v47 = vld [vmem:[%s692_s3 + $0x58] sm:$0xff]  ;;  %v283_v49 = vld [vmem:[%s692_s3 + $0x70] sm:$0xff] }
  0x15   :  { %92 = vperm.xlu1 %445, %v46_v17   ;;  %87 = vperm.xlu0 %444, %v45_v18   ;;  %v284_v48 = vld [vmem:[%s692_s3 + $0x78] sm:$0xff] }
  0x16   :  { %425 = vmatmul.msk.f32.gmra.mxu0 %vm135_vm1, %v24_v19  ;;  %429 = vmatmul.msk.f32.gmra.mxu1 %vm135_vm1, %v28_v20 }
  0x17   :  { %433 = vmatmul.msk.f32.gmra.mxu2 %vm135_vm1, %v32_v21 }
  0x18   :  { %437 = vmatmul.msk.f32.gmra.mxu3 %vm135_vm1, %v36_v22 }
  0x1c   :  { %112 = vperm.xlu2 %446, %v50_v23  }
  0x1d   :  { %107 = vperm.xlu1 %445, %v49_v24   ;;  %102 = vperm.xlu0 %444, %v48_v25  }
  0x1e   :  { %426 = vmatmul.msk.f32.gmra.mxu0 %vm135_vm1, %v25_v26  ;;  %430 = vmatmul.msk.f32.gmra.mxu1 %vm135_vm1, %v29_v27 }
  0x1f   :  { %434 = vmatmul.msk.f32.gmra.mxu2 %vm135_vm1, %v33_v28 }
  0x20   :  { %438 = vmatmul.msk.f32.gmra.mxu3 %vm135_vm1, %v37_v29 }
  0x24   :  { %127 = vperm.xlu2 %446, %v53_v30  }
  0x25   :  { %122 = vperm.xlu1 %445, %v52_v31   ;;  %117 = vperm.xlu0 %444, %v51_v32  }
  0x2c   :  { %292 = vperm.xlu2 %446, %v270_v33  }
  0x2d   :  { %287 = vperm.xlu1 %445, %v269_v34   ;;  %132 = vperm.xlu0 %444, %v54_v35  }
  0x34   :  { %307 = vperm.xlu2 %446, %v273_v36  }
  0x35   :  { %302 = vperm.xlu1 %445, %v272_v37   ;;  %297 = vperm.xlu0 %444, %v271_v38  }
  0x3c   :  { %322 = vperm.xlu2 %446, %v276_v39  }
  0x3d   :  { %317 = vperm.xlu1 %445, %v275_v40   ;;  %312 = vperm.xlu0 %444, %v274_v41  }
  0x44   :  { %337 = vperm.xlu2 %446, %v279_v42  }
  0x45   :  { %332 = vperm.xlu1 %445, %v278_v43   ;;  %327 = vperm.xlu0 %444, %v277_v44  }
  0x4c   :  { %352 = vperm.xlu2 %446, %v282_v45  }
  0x4d   :  { %347 = vperm.xlu1 %445, %v281_v46   ;;  %342 = vperm.xlu0 %444, %v280_v47  }
  0x55   :  { %362 = vperm.xlu1 %445, %v284_v48   ;;  %357 = vperm.xlu0 %444, %v283_v49  }
  0x5e   :  { %v78_v50 = vpop.permute.xlu2 %77 }
  0x66   :  { %v83_v51 = vpop.permute.xlu2 %82 }
  0x6e   :  { %v98_v54 = vpop.permute.xlu2 %97 }
  0x76   :  { %v668_v58 = vpop.permute.xlu2 %112 }
  0x77   :  { %v68_v52 = vpop.permute.xlu1 %67  ;;  %v58_v53 = vpop.permute.xlu0 %57 }
  0x7e   :  { %v670_v1 = vpop.permute.xlu2 %127 }
  0x7f   :  { %v73_v55 = vpop.permute.xlu1 %72  ;;  %v63_v56 = vpop.permute.xlu0 %62 }
  0x83   :  { %v205_v57 = vpop.f32.mrf.mxu0  ;;  %v217_v61 = vpop.f32.mrf.mxu1 }
  0x84   :  { %v206_v8 = vadd.f32 %v205_v57, %v58_v53  ;;  %v218_v26 = vadd.f32 %v217_v61, %v78_v50 }
  0x86   :  { %v293_v7 = vpop.permute.xlu2 %292  ;;  %v253_v14 = vmax.f32 %v206_v8, 0.0  ;;  %v257_v34 = vmax.f32 %v218_v26, 0.0 }
  0x87   :  { %v93_v59 = vpop.permute.xlu1 %92  ;;  %v88_v60 = vpop.permute.xlu0 %87 }
  0x8a   :  { %v229_v6 = vpop.f32.mrf.mxu2 }
  0x8b   :  { %v208_v62 = vpop.f32.mrf.mxu0  ;;  %v220_v2 = vpop.f32.mrf.mxu1  ;;  %v230_v48 = vadd.f32 %v229_v6, %v98_v54 }
  0x8c   :  { %v209_v9 = vadd.f32 %v208_v62, %v63_v56  ;;  %v241_v15 = vpop.f32.mrf.mxu3  ;;  %v221_v30 = vadd.f32 %v220_v2, %v83_v51 }
  0x8e   :  { %v254_v16 = vmax.f32 %v209_v9, 0.0  ;;  %v308_v19 = vpop.permute.xlu2 %307  ;;  %v258_v39 = vmax.f32 %v221_v30, 0.0 }
  0x8f   :  { %v108_v63 = vpop.permute.xlu1 %107  ;;  %v103_v0 = vpop.permute.xlu0 %102  ;;  %v369_v40 = vmul.f32 %v308_v19, %v257_v34 }
  0x90   :  { %v366_v22 = vmul.f32 %v293_v7, %v254_v16 }
  0x92   :  { %v232_v17 = vpop.f32.mrf.mxu2 }
  0x93   :  { %v211_v3 = vpop.f32.mrf.mxu0  ;;  %v223_v12 = vpop.f32.mrf.mxu1 }
  0x94   :  { %v212_v18 = vadd.f32 %v211_v3, %v68_v52  ;;  %v244_v35 = vpop.f32.mrf.mxu3  ;;  %v224_v36 = vadd.f32 %v223_v12, %v88_v60  ;;  %v233_v52 = vadd.f32 %v232_v17, %v103_v0 }
  0x96   :  { %v255_v23 = vmax.f32 %v212_v18, 0.0  ;;  %v323_v41 = vpop.permute.xlu2 %322  ;;  %v259_v45 = vmax.f32 %v224_v36, 0.0  ;;  %v262_v2 = vmax.f32 %v233_v52, 0.0 }
  0x97   :  { %v672_v4 = vpop.permute.xlu1 %122  ;;  %v674_v5 = vpop.permute.xlu0 %117 }
  0x98   :  { %v242_v6 = vadd.f32 %v241_v15, %v674_v5  ;;  %v245_v18 = vadd.f32 %v244_v35, %v672_v4 }
  0x9a   :  { %v235_v37 = vpop.f32.mrf.mxu2  ;;  %v265_v19 = vmax.f32 %v242_v6, 0.0 }
  0x9b   :  { %v214_v13 = vpop.f32.mrf.mxu0  ;;  %v226_v33 = vpop.f32.mrf.mxu1  ;;  %v236_v3 = vadd.f32 %v235_v37, %v108_v63 }
  0x9c   :  { %v215_v20 = vadd.f32 %v214_v13, %v73_v55  ;;  %v227_v42 = vadd.f32 %v226_v33, %v93_v59  ;;  %v261_v55 = vmax.f32 %v230_v48, 0.0  ;;  %v247_v56 = vpop.f32.mrf.mxu3 }
  0x9d   :  { %v263_v12 = vmax.f32 %v236_v3, 0.0 }
  0x9e   :  { %v256_v27 = vmax.f32 %v215_v20, 0.0  ;;  %v260_v49 = vmax.f32 %v227_v42, 0.0  ;;  %v338_v8 = vpop.permute.xlu2 %337 }
  0x9f   :  { %v288_v10 = vpop.permute.xlu1 %287  ;;  %v676_v11 = vpop.permute.xlu0 %132  ;;  %v375_v13 = vmul.f32 %v338_v8, %v263_v12 }
  0xa0   :  { %v365_v21 = vmul.f32 %v288_v10, %v253_v14  ;;  %v372_v57 = vmul.f32 %v323_v41, %v260_v49 }
  0xa2   :  { %v381_v28 = vadd.f32 %v366_v22, %v365_v21  ;;  %v238_v60 = vpop.f32.mrf.mxu2  ;;  %v248_v22 = vadd.f32 %v247_v56, %v670_v1 }
  0xa3   :  { %v239_v9 = vadd.f32 %v238_v60, %v668_v58 }
  0xa4   :  { %v250_v21 = vpop.f32.mrf.mxu3  ;;  %v267_v26 = vmax.f32 %v248_v22, 0.0 }
  0xa5   :  { %v264_v14 = vmax.f32 %v239_v9, 0.0  ;;  %v251_v5 = vadd.f32 %v250_v21, %v676_v11  ;;  %v403_v11 = vstv %s693_s4 }
  0xa7   :  { %v303_v24 = vpop.permute.xlu1 %302  ;;  %v298_v25 = vpop.permute.xlu0 %297  ;;  %v268_v30 = vmax.f32 %v251_v5, 0.0 }
  0xa8   :  { %v367_v29 = vmul.f32 %v298_v25, %v255_v23  ;;  %v368_v31 = vmul.f32 %v303_v24, %v256_v27  ;;  %v353_v24 = vpop.permute.xlu2 %352  ;;  %v266_v25 = vmax.f32 %v245_v18, 0.0 }
  0xaa   :  { %v382_v32 = vadd.f32 %v381_v28, %v367_v29  ;;  %v378_v27 = vmul.f32 %v353_v24, %v266_v25 }
  0xac   :  { %v383_v38 = vadd.f32 %v382_v32, %v368_v31 }
  0xae   :  { %v384_v47 = vadd.f32 %v383_v38, %v369_v40 }
  0xaf   :  { %v318_v43 = vpop.permute.xlu1 %317  ;;  %v313_v44 = vpop.permute.xlu0 %312 }
  0xb0   :  { %v370_v46 = vmul.f32 %v313_v44, %v258_v39  ;;  %v371_v50 = vmul.f32 %v318_v43, %v259_v45 }
  0xb2   :  { %v385_v51 = vadd.f32 %v384_v47, %v370_v46 }
  0xb4   :  { %v386_v53 = vadd.f32 %v385_v51, %v371_v50 }
  0xb6   :  { %v387_v7 = vadd.f32 %v386_v53, %v372_v57 }
  0xb7   :  { %v333_v61 = vpop.permute.xlu1 %332  ;;  %v328_v62 = vpop.permute.xlu0 %327 }
  0xb8   :  { %v373_v59 = vmul.f32 %v328_v62, %v261_v55  ;;  %v374_v10 = vmul.f32 %v333_v61, %v262_v2 }
  0xba   :  { %v388_v54 = vadd.f32 %v387_v7, %v373_v59 }
  0xbc   :  { %v389_v0 = vadd.f32 %v388_v54, %v374_v10 }
  0xbe   :  { %v390_v63 = vadd.f32 %v389_v0, %v375_v13 }
  0xbf   :  { %v348_v16 = vpop.permute.xlu1 %347  ;;  %v343_v17 = vpop.permute.xlu0 %342 }
  0xc0   :  { %v376_v20 = vmul.f32 %v343_v17, %v264_v14  ;;  %v377_v23 = vmul.f32 %v348_v16, %v265_v19 }
  0xc2   :  { %v391_v58 = vadd.f32 %v390_v63, %v376_v20 }
  0xc4   :  { %v392_v15 = vadd.f32 %v391_v58, %v377_v23 }
  0xc6   :  { %v393_v4 = vadd.f32 %v392_v15, %v378_v27 }
  0xc7   :  { %v363_v28 = vpop.permute.xlu1 %362  ;;  %v358_v29 = vpop.permute.xlu0 %357 }
  0xc8   :  { %v379_v31 = vmul.f32 %v358_v29, %v267_v26  ;;  %v380_v32 = vmul.f32 %v363_v28, %v268_v30 }
  0xca   :  { %v394_v33 = vadd.f32 %v393_v4, %v379_v31 }
  0xcc   :  { %v395_v34 = vadd.f32 %v394_v33, %v380_v32 }
  0xce   :  { %v396_v35 = vrot.slane %v395_v34, 4 }
  0xd0   :  { %v397_v36 = vadd.f32 %v396_v35, %v395_v34 }
  0xd2   :  { %v398_v1 = vrot.slane %v397_v36, 2 }
  0xd4   :  { %v399_v37 = vadd.f32 %v398_v1, %v397_v36 }
  0xd6   :  { %v400_v38 = vrot.slane %v399_v37, 1 }
  0xd8   :  { %v401_v39 = vadd.f32 %v400_v38, %v399_v37 }
  0xda   :  { %v404_v40 = vadd.f32 %v403_v11, %v401_v39 }
  0xdc   :  { %405 = vst [vmem:[#allocation3] sm:$0x1] %v404_v40 }
  0xdd   :  { %416 = dma.vmem_to_hbm [thread:$0]  %s412_s11, 16, %s414_s14, [#allocation4]  }
  0xde   :  { %471 = dma.done.wait [#allocation4], 16  }
  0xdf   :  { %472 = vsyncadd [#allocation4], 4294967280 }
  0xe0   :  { %421 = vsyncpa [#allocation4], 1 }

</bundles_post_ra>
